<compile_context>
chip_gen: v7x
topology: tpu7x:2x2x1
jax: 0.10.0
libtpu: 0.0.40
codegen_flags: <defaults>
</compile_context>

<pallas_src>
import jax
import jax.numpy as jnp
from jax.experimental import pallas as pl
from jax.experimental.pallas import tpu as pltpu

GAMMA = 0.1
BETA = 1.0
THETA = 3.0


def _round_up(x, m):
    return ((x + m - 1) // m) * m


def _cdiv(a, b):
    return -(-a // b)


def _vmem_capacity_bytes():
    """Physical VMEM of the local chip; conservative v7x fallback."""
    try:
        return int(pltpu.get_tpu_info().vmem_capacity_bytes)
    except Exception:
        return 64 * 1024 * 1024


def _weight_spec(shape):
    """BlockSpec for a grid-resident weight.

    The index_map is constant across the batch grid, so a single VMEM buffer
    suffices -> request Buffered(1) to halve the resident-weight footprint
    (matters most on v7x's 64 MiB VMEM).  Falls back cleanly if this jax
    version's BlockSpec does not accept pipeline_mode.
    """
    index_map = lambda i: (0, 0)
    try:
        return pl.BlockSpec(shape, index_map, pipeline_mode=pl.Buffered(1))
    except (TypeError, ValueError, AttributeError):
        return pl.BlockSpec(shape, index_map)


def _vmem_limit_bytes(tb, d_in, d_out_pad, weights):
    """Explicit scoped-VMEM budget: resident weights (x2 in case the
    single-buffer request is ignored) + double-buffered x/out tiles +
    generous headroom for intermediates."""
    w_itemsize = weights[0].dtype.itemsize
    w_bytes = sum(int(w.size) * w.dtype.itemsize for w in weights)
    x_tile = tb * d_in * w_itemsize
    out_tile = tb * d_out_pad * 4
    widest = max([d_in] + [int(w.shape[1]) for w in weights])
    inter = tb * widest * (4 + w_itemsize)  # f32 activation + narrow matmul copy
    budget = 2 * w_bytes + 2 * x_tile + 2 * out_tile + 4 * inter + (1 << 20)
    cap = _vmem_capacity_bytes()
    return int(min(int(0.9 * cap), max(budget, 16 * 1024 * 1024)))


def _fused_teacher_kernel(x_ref, *rest):
    """All teacherNet layers fused in one body.

    rest = (*w_refs, o_ref).  Each w_ref holds the pre-transposed,
    pre-k-scaled (bf16) weight of shape (in, out); weights are VMEM-resident
    across the batch grid, intermediates never touch HBM.
    """
    *w_refs, o_ref = rest
    a = x_ref[...]
    for w_ref in w_refs:
        # bf16 ingress for the MXU, f32 accumulation + f32 softplus.
        z = jnp.dot(a.astype(w_ref.dtype), w_ref[...],
                    preferred_element_type=jnp.float32)
        # gamma * log(1 + exp(beta*(z - theta))), overflow-safe via logaddexp.
        # (EUP-bound: the exp/log dominate these tiny matmuls by design.)
        a = GAMMA * jnp.logaddexp(0.0, BETA * (z - THETA))
    o_ref[...] = a.astype(o_ref.dtype)


def teacher_forward(x, weights_t_scaled, d_out, *, max_batch_tile=512):
    """Run the fused teacherNet forward.

    x:                (B, d_in) float32
    weights_t_scaled: list of (d_in_i, d_out_i) arrays, already k-scaled and
                      transposed; the last one is zero-padded to a multiple of
                      128 output columns (lane-dense store).
    d_out:            true (unpadded) output width.
    """
    b, d_in = x.shape
    d_out_pad = int(weights_t_scaled[-1].shape[1])
    compute_dtype = jnp.dtype(weights_t_scaled[0].dtype)

    # Cast x once at the boundary (halves x HBM/VMEM bytes when bf16).
    x = x.astype(compute_dtype)
    align = 16 if compute_dtype.itemsize == 2 else 8

    # Balanced batch tiles: avoid a mostly-padding final tile, and give the
    # grid >= 2 steps whenever possible so both TensorCores get work on v7x
    # (on single-TC v5e/v6e the grid is a serial loop; one extra step ~0.35us).
    n_tiles = _cdiv(b, max_batch_tile)
    if n_tiles == 1 and b > align:
        n_tiles = 2
    tb = _round_up(_cdiv(b, n_tiles), align)
    grid_n = _cdiv(b, tb)
    b_pad = grid_n * tb
    if b_pad != b:
        x = jnp.pad(x, ((0, b_pad - b), (0, 0)))

    in_specs = [pl.BlockSpec((tb, d_in), lambda i: (i, 0))]
    for w in weights_t_scaled:
        in_specs.append(_weight_spec(tuple(int(s) for s in w.shape)))

    out = pl.pallas_call(
        _fused_teacher_kernel,
        out_shape=jax.ShapeDtypeStruct((b_pad, d_out_pad), jnp.float32),
        grid=(grid_n,),
        in_specs=in_specs,
        out_specs=pl.BlockSpec((tb, d_out_pad), lambda i: (i, 0)),
        compiler_params=pltpu.CompilerParams(
            dimension_semantics=("parallel",),
            vmem_limit_bytes=_vmem_limit_bytes(tb, d_in, d_out_pad,
                                               weights_t_scaled)),
    )(x, *weights_t_scaled)
    return out[:b, :d_out]


class TeacherNetPallas:
    """JAX/Pallas equivalent of teacherNet.

    size_tab: list of layer widths (args.size_tab_teacher)
    k_tab:    per-layer scalar multipliers (args.k_tab)
    """

    def __init__(self, size_tab, k_tab, key, *, weight_dtype=jnp.bfloat16):
        assert len(k_tab) >= len(size_tab) - 1
        self.size_tab = size_tab
        self.k_tab = k_tab
        self.d_out = int(size_tab[-1])
        self.weights = []           # PyTorch-layout (out, in) f32, reference only
        self.weights_t_scaled = []  # (in, out), k-scaled, MXU-dtype, last lane-padded
        n_layers = len(size_tab) - 1
        for i in range(n_layers):
            key, sub = jax.random.split(key)
            w = jax.random.uniform(
                sub, (size_tab[i + 1], size_tab[i]),
                minval=-1.0, maxval=1.0, dtype=jnp.float32)
            self.weights.append(w)
            # One-time layout + scale fix: fold k and the transpose in (in f32,
            # *before* any bf16 rounding) so the forward does no transposes and
            # no extra VPU multiplies.
            wt = float(k_tab[i]) * w.T
            if i == n_layers - 1:
                # Lane-dense output store: zero-pad output columns to 128*n.
                d_out_pad = _round_up(self.d_out, 128)
                if d_out_pad != self.d_out:
                    wt = jnp.pad(wt, ((0, 0), (0, d_out_pad - self.d_out)))
            self.weights_t_scaled.append(wt.astype(weight_dtype))

    def __call__(self, x, *, max_batch_tile=512):
        return teacher_forward(x, self.weights_t_scaled, self.d_out,
                               max_batch_tile=max_batch_tile)


def _reference_forward_f32(x, weights, k_tab):
    # Original-module semantics (stable softplus form; log(1+exp(t)) == logaddexp(0,t)).
    a = x
    for i, w in enumerate(weights):
        z = k_tab[i] * (a @ w.T)
        a = GAMMA * jnp.logaddexp(0.0, BETA * (z - THETA))
    return a


def _reference_forward_mirrored(x, weights_t_scaled, d_out):
    # Exact math the kernel performs (incl. bf16 rounding of matmul operands,
    # f32 accumulation), computed with plain XLA ops — tight correctness check.
    a = x
    for w in weights_t_scaled:
        lhs = a.astype(w.dtype).astype(jnp.float32)
        rhs = w.astype(jnp.float32)
        z = lhs @ rhs
        a = GAMMA * jnp.logaddexp(0.0, BETA * (z - THETA))
    return a[:, :d_out]


if __name__ == "__main__":
    key = jax.random.PRNGKey(0)
    key_w, key_x = jax.random.split(key)

    # Small synthetic config consistent with the module's __init__.
    size_tab_teacher = [32, 64, 32, 16]
    k_tab = [1.0, 0.5, 2.0]
    batch = 8

    net = TeacherNetPallas(size_tab_teacher, k_tab, key_w)
    x = jax.random.normal(key_x, (batch, size_tab_teacher[0]), dtype=jnp.float32)

    out = jax.block_until_ready(net(x))
    assert out.shape == (batch, size_tab_teacher[-1])
    assert out.dtype == jnp.float32

    # Tight check: kernel vs an XLA implementation of the exact same math.
    ref_tight = _reference_forward_mirrored(x, net.weights_t_scaled, net.d_out)
    assert jnp.allclose(out, ref_tight, atol=1e-4, rtol=1e-4), (
        "max |diff| =", float(jnp.max(jnp.abs(out - ref_tight))))

    # Loose check: semantics of the original f32 teacherNet forward are
    # preserved (small deviation expected from bf16 matmul ingress).
    ref_f32 = _reference_forward_f32(x, net.weights, k_tab)
    assert jnp.allclose(out, ref_f32, atol=2e-2, rtol=2e-2), (
        "max |diff| =", float(jnp.max(jnp.abs(out - ref_f32))))

    print("KERNEL_OK")
</pallas_src>

<mosaic_0001>
module attributes {stable_mosaic.version = 11 : i64} {
  func.func @_fused_teacher_kernel(%arg0: i32, %arg1: memref<16x32xbf16, #tpu.memory_space<vmem>>, %arg2: memref<32x64xbf16, #tpu.memory_space<vmem>>, %arg3: memref<64x32xbf16, #tpu.memory_space<vmem>>, %arg4: memref<32x128xbf16, #tpu.memory_space<vmem>>, %arg5: memref<16x128xf32, #tpu.memory_space<vmem>>) attributes {dimension_semantics = [#tpu.dimension_semantics<parallel>], iteration_bounds = array<i64: 1>, scalar_prefetch = 0 : i64, scratch_operands = 0 : i64, tpu.core_type = #tpu.core_type<tc>, window_params = [{transform_indices = @transform_0, window_bounds = array<i64: 16, 32>}, {pipeline_mode = #tpu.pipeline_mode<synchronous>, transform_indices = @transform_1, window_bounds = array<i64: 32, 64>}, {pipeline_mode = #tpu.pipeline_mode<synchronous>, transform_indices = @transform_2, window_bounds = array<i64: 64, 32>}, {pipeline_mode = #tpu.pipeline_mode<synchronous>, transform_indices = @transform_3, window_bounds = array<i64: 32, 128>}, {transform_indices = @transform_4, window_bounds = array<i64: 16, 128>}]} {
    %c0 = arith.constant 0 : index
    %c0_0 = arith.constant 0 : index
    %0 = vector.load %arg1[%c0, %c0_0] : memref<16x32xbf16, #tpu.memory_space<vmem>>, vector<16x32xbf16>
    %c0_1 = arith.constant 0 : index
    %c0_2 = arith.constant 0 : index
    %1 = vector.load %arg2[%c0_1, %c0_2] : memref<32x64xbf16, #tpu.memory_space<vmem>>, vector<32x64xbf16>
    %cst = arith.constant dense<0.000000e+00> : vector<16x64xf32>
    %2 = tpu.matmul %0, %1, %cst {dimension_numbers = #tpu.dot_dimension_numbers<[1], [0], [0], [1], [0, 0, 1, 1], [], []>} : vector<16x32xbf16>, vector<32x64xbf16>, vector<16x64xf32> -> vector<16x64xf32>
    %cst_3 = arith.constant 3.000000e+00 : f32
    %3 = vector.broadcast %cst_3 : f32 to vector<16x64xf32>
    %4 = arith.subf %2, %3 : vector<16x64xf32>
    %cst_4 = arith.constant 1.000000e+00 : f32
    %5 = vector.broadcast %cst_4 : f32 to vector<16x64xf32>
    %6 = arith.mulf %5, %4 : vector<16x64xf32>
    %cst_5 = arith.constant 0.000000e+00 : f32
    %7 = vector.broadcast %cst_5 : f32 to vector<16x64xf32>
    %8 = arith.maximumf %7, %6 : vector<16x64xf32>
    %9 = vector.broadcast %cst_5 : f32 to vector<16x64xf32>
    %10 = arith.subf %9, %6 : vector<16x64xf32>
    %11 = arith.cmpf one, %10, %10 : vector<16x64xf32>
    %12 = vector.broadcast %cst_5 : f32 to vector<16x64xf32>
    %13 = arith.addf %12, %6 : vector<16x64xf32>
    %14 = math.absf %10 : vector<16x64xf32>
    %cst_6 = arith.constant 0.000000e+00 : f32
    %15 = vector.broadcast %cst_6 : f32 to vector<16x64xf32>
    %16 = arith.subf %15, %14 : vector<16x64xf32>
    %17 = math.exp %16 : vector<16x64xf32>
    %18 = math.log1p %17 : vector<16x64xf32>
    %19 = arith.addf %8, %18 : vector<16x64xf32>
    %20 = arith.select %11, %13, %19 : vector<16x64xi1>, vector<16x64xf32>
    %cst_7 = arith.constant 1.000000e-01 : f32
    %21 = vector.broadcast %cst_7 : f32 to vector<16x64xf32>
    %22 = arith.mulf %21, %20 : vector<16x64xf32>
    %23 = arith.truncf %22 : vector<16x64xf32> to vector<16x64xbf16>
    %c0_8 = arith.constant 0 : index
    %c0_9 = arith.constant 0 : index
    %24 = vector.load %arg3[%c0_8, %c0_9] : memref<64x32xbf16, #tpu.memory_space<vmem>>, vector<64x32xbf16>
    %cst_10 = arith.constant dense<0.000000e+00> : vector<16x32xf32>
    %25 = tpu.matmul %23, %24, %cst_10 {dimension_numbers = #tpu.dot_dimension_numbers<[1], [0], [0], [1], [0, 0, 1, 1], [], []>} : vector<16x64xbf16>, vector<64x32xbf16>, vector<16x32xf32> -> vector<16x32xf32>
    %cst_11 = arith.constant 3.000000e+00 : f32
    %26 = vector.broadcast %cst_11 : f32 to vector<16x32xf32>
    %27 = arith.subf %25, %26 : vector<16x32xf32>
    %cst_12 = arith.constant 1.000000e+00 : f32
    %28 = vector.broadcast %cst_12 : f32 to vector<16x32xf32>
    %29 = arith.mulf %28, %27 : vector<16x32xf32>
    %cst_13 = arith.constant 0.000000e+00 : f32
    %30 = vector.broadcast %cst_13 : f32 to vector<16x32xf32>
    %31 = arith.maximumf %30, %29 : vector<16x32xf32>
    %32 = vector.broadcast %cst_13 : f32 to vector<16x32xf32>
    %33 = arith.subf %32, %29 : vector<16x32xf32>
    %34 = arith.cmpf one, %33, %33 : vector<16x32xf32>
    %35 = vector.broadcast %cst_13 : f32 to vector<16x32xf32>
    %36 = arith.addf %35, %29 : vector<16x32xf32>
    %37 = math.absf %33 : vector<16x32xf32>
    %cst_14 = arith.constant 0.000000e+00 : f32
    %38 = vector.broadcast %cst_14 : f32 to vector<16x32xf32>
    %39 = arith.subf %38, %37 : vector<16x32xf32>
    %40 = math.exp %39 : vector<16x32xf32>
    %41 = math.log1p %40 : vector<16x32xf32>
    %42 = arith.addf %31, %41 : vector<16x32xf32>
    %43 = arith.select %34, %36, %42 : vector<16x32xi1>, vector<16x32xf32>
    %cst_15 = arith.constant 1.000000e-01 : f32
    %44 = vector.broadcast %cst_15 : f32 to vector<16x32xf32>
    %45 = arith.mulf %44, %43 : vector<16x32xf32>
    %46 = arith.truncf %45 : vector<16x32xf32> to vector<16x32xbf16>
    %c0_16 = arith.constant 0 : index
    %c0_17 = arith.constant 0 : index
    %47 = vector.load %arg4[%c0_16, %c0_17] : memref<32x128xbf16, #tpu.memory_space<vmem>>, vector<32x128xbf16>
    %cst_18 = arith.constant dense<0.000000e+00> : vector<16x128xf32>
    %48 = tpu.matmul %46, %47, %cst_18 {dimension_numbers = #tpu.dot_dimension_numbers<[1], [0], [0], [1], [0, 0, 1, 1], [], []>} : vector<16x32xbf16>, vector<32x128xbf16>, vector<16x128xf32> -> vector<16x128xf32>
    %cst_19 = arith.constant 3.000000e+00 : f32
    %49 = vector.broadcast %cst_19 : f32 to vector<16x128xf32>
    %50 = arith.subf %48, %49 : vector<16x128xf32>
    %cst_20 = arith.constant 1.000000e+00 : f32
    %51 = vector.broadcast %cst_20 : f32 to vector<16x128xf32>
    %52 = arith.mulf %51, %50 : vector<16x128xf32>
    %cst_21 = arith.constant 0.000000e+00 : f32
    %53 = vector.broadcast %cst_21 : f32 to vector<16x128xf32>
    %54 = arith.maximumf %53, %52 : vector<16x128xf32>
    %55 = vector.broadcast %cst_21 : f32 to vector<16x128xf32>
    %56 = arith.subf %55, %52 : vector<16x128xf32>
    %57 = arith.cmpf one, %56, %56 : vector<16x128xf32>
    %58 = vector.broadcast %cst_21 : f32 to vector<16x128xf32>
    %59 = arith.addf %58, %52 : vector<16x128xf32>
    %60 = math.absf %56 : vector<16x128xf32>
    %cst_22 = arith.constant 0.000000e+00 : f32
    %61 = vector.broadcast %cst_22 : f32 to vector<16x128xf32>
    %62 = arith.subf %61, %60 : vector<16x128xf32>
    %63 = math.exp %62 : vector<16x128xf32>
    %64 = math.log1p %63 : vector<16x128xf32>
    %65 = arith.addf %54, %64 : vector<16x128xf32>
    %66 = arith.select %57, %59, %65 : vector<16x128xi1>, vector<16x128xf32>
    %cst_23 = arith.constant 1.000000e-01 : f32
    %67 = vector.broadcast %cst_23 : f32 to vector<16x128xf32>
    %68 = arith.mulf %67, %66 : vector<16x128xf32>
    %c0_24 = arith.constant 0 : index
    %c0_25 = arith.constant 0 : index
    %69 = vector.load %arg5[%c0_24, %c0_25] : memref<16x128xf32, #tpu.memory_space<vmem>>, vector<16x128xf32>
    tpu.vector_store %arg5[%c0_24, %c0_25], %68 {strides = array<i32>} : memref<16x128xf32, #tpu.memory_space<vmem>>, vector<16x128xf32>,
    return
  }
  func.func @transform_0(%arg0: i32) -> (i32, i32) {
    %c0_i32 = arith.constant 0 : i32
    %c0_i32_0 = arith.constant 0 : i32
    return %arg0, %c0_i32 : i32, i32
  }
  func.func @transform_1(%arg0: i32) -> (i32, i32) {
    %c0_i32 = arith.constant 0 : i32
    %c0_i32_0 = arith.constant 0 : i32
    %c0_i32_1 = arith.constant 0 : i32
    return %c0_i32, %c0_i32_0 : i32, i32
  }
  func.func @transform_2(%arg0: i32) -> (i32, i32) {
    %c0_i32 = arith.constant 0 : i32
    %c0_i32_0 = arith.constant 0 : i32
    %c0_i32_1 = arith.constant 0 : i32
    return %c0_i32, %c0_i32_0 : i32, i32
  }
  func.func @transform_3(%arg0: i32) -> (i32, i32) {
    %c0_i32 = arith.constant 0 : i32
    %c0_i32_0 = arith.constant 0 : i32
    %c0_i32_1 = arith.constant 0 : i32
    return %c0_i32, %c0_i32_0 : i32, i32
  }
  func.func @transform_4(%arg0: i32) -> (i32, i32) {
    %c0_i32 = arith.constant 0 : i32
    %c0_i32_0 = arith.constant 0 : i32
    return %arg0, %c0_i32 : i32, i32
  }
}

</mosaic_0001>

<bundles_post_ra>
// kernel: tpu_custom_call.1
= control target key start
LH: loop header
LB: loop body
LE: loop exit
PB: predicated region body
PF: predicated region fallthrough
CT: control target
= control target key end

     0   :  { %v489_v1 = vmov 0.0   ;;  %vm490_vm0 = vmmov 0   ;;  %vm42_vm1 = vcmask 261120   ;;  %s571_s0 = inlined_call_operand.vmem [shape: bf16[16,32], index: 0, kind: input, shape index: {}]   ;;  %s572_s1 = inlined_call_operand.vmem [shape: bf16[32,64], index: 1, kind: input, shape index: {}]   ;;  %s573_s2 = inlined_call_operand.vmem [shape: bf16[64,32], index: 2, kind: input, shape index: {}]   ;;  %s574_s3 = inlined_call_operand.vmem [shape: bf16[32,128], index: 3, kind: input, shape index: {}]   ;;  %s575_s4 = inlined_call_operand.hbm [shape: f32[16,128], index: 4, kind: output, shape index: {}]  }
   0x1   :  { %v432_v0 = vld [vmem:[%s572_s1] sm:$0xff]   ;;  %399 = vmatprep.subr.bf16.mxu0 %v489_v1  ;;  %407 = vmatprep.subr.bf16.mxu1 %v489_v1  ;;  %v433_v2 = vld [vmem:[%s572_s1 + $0x8] sm:$0xff]  }
   0x2   :  { %400 = vmatpush3.bf16.msra.mxu0 %v432_v0  ;;  %403 = vmatprep.mubr.msk.bf16.mxu0 %vm490_vm0, %v489_v1  ;;  %v434_v3 = vld [vmem:[%s571_s0] sm:$0xff]  }
   0x3   :  { %401 = vmatprep.subr.bf16.mxu0 %v489_v1  ;;  %415 = vmatprep.mubr.msk.bf16.mxu1 %vm490_vm0, %v489_v1 }
   0x6   :  { %402 = vmatpush3.bf16.msra.mxu0 %v433_v2 }
   0x7   :  { %419 = vmatprep.subr.bf16.mxu0 %v489_v1 }
   0x8   :  { %9 = vsyncpa [#allocation3], 0  ;;  %v435_v4 = vld [vmem:[%s573_s2] sm:$0xff]   ;;  %v436_v5 = vld [vmem:[%s573_s2 + $0x8] sm:$0xff]   ;;  %vm162_vm6 = vcmask 523264  }
   0x9   :  { %404 = vmatmul.mubr.msk.bf16.vlgmr.msra.gmra.mrb[0].mxu0 %vm42_vm1, %v434_v3  ;;  %408 = vmatpush3.bf16.msra.mxu1 %v435_v4  ;;  %v437_v6 = vld [vmem:[%s573_s2 + $0x10] sm:$0xff]   ;;  %v438_v7 = vld [vmem:[%s573_s2 + $0x18] sm:$0xff]   ;;  %v439_v49 = vld [vmem:[%s574_s3] sm:$0xff]  }
   0xa   :  { %423 = vmatprep.mubr.msk.bf16.mxu0 %vm490_vm0, %v489_v1  ;;  %409 = vmatprep.subr.bf16.mxu1 %v489_v1  ;;  %v440_v50 = vld [vmem:[%s574_s3 + $0x8] sm:$0xff]   ;;  %s491_s3 = smov [#allocation2]  }
   0xb   :  { %420 = vmatpush3.bf16.msra.mxu0 %v439_v49  ;;  %s359_s30 = sshll.u32 %s491_s3, 4  ;;  %s360_s30 = int_to_ptr.vmem [resolvable:$true] %s359_s30 }
   0xc   :  { %421 = vmatprep.subr.bf16.mxu0 %v489_v1  ;;  %s465_s5 = scalar_lea.vmem %s360_s30, 256  ;;  %p470_p1 = scmp.lt.s32.totalorder %s360_s30, %s360_s30 }
   0xd   :  { %410 = vmatpush3.bf16.msra.mxu1 %v436_v5  ;;  %p466_p0 = scmp.ne.s32.totalorder %s360_s30, %s465_s5  ;;  %p471_p2 = scmp.lt.s32.totalorder %s465_s5, %s465_s5 }
   0xe   :  { %411 = vmatprep.subr.bf16.mxu1 %v489_v1 }
   0xf   :  { %422 = vmatpush3.bf16.msra.mxu0 %v440_v50  ;;  %p472_p3 = por %p471_p2, %p470_p1 }
  0x11   :  { %412 = vmatpush3.bf16.msra.mxu1 %v437_v6  ;;  %p473_p4 = pnand %p472_p3, %p466_p0 }
  0x12   :  { %413 = vmatprep.subr.bf16.mxu1 %v489_v1 }
  0x15   :  { %414 = vmatpush3.bf16.msra.mxu1 %v438_v7 }
  0xdc   :  { %v80_v8 = vpop.f32.mrb[0].mxu0 }
  0xdd   :  { %v374_v9 = vadd.f32 -3.0, %v80_v8  ;;  %v405_v10 = vpop.f32.mrb[1].mxu0 }
  0xde   :  { %v83_v11 = vpop.f32.mrb[2].mxu0 }
  0xdf   :  { %v91_v12 = vsub.f32 0.0, %v374_v9  ;;  %v375_v13 = vadd.f32 -3.0, %v83_v11  ;;  %v406_v14 = vpop.f32.mrb[3].mxu0  ;;  %v89_v36 = vmax.f32 %v374_v9, 0.0 }
  0xe1   :  { %v97_v15 = vand.u32 2147483647, %v91_v12  ;;  %v92_v16 = vsub.f32 0.0, %v375_v13  ;;  %v90_v41 = vmax.f32 %v375_v13, 0.0  ;;  %vm93_vm4 = vcmp.ne.f32.partialorder %v91_v12, %v91_v12 }
  0xe3   :  { %v99_v17 = vsub.f32 0.0, %v97_v15  ;;  %v98_v18 = vand.u32 2147483647, %v92_v16  ;;  %vm94_vm5 = vcmp.ne.f32.partialorder %v92_v16, %v92_v16 }
  0xe5   :  { %v101_v19 = vmul.f32 1.442695, %v99_v17  ;;  %v100_v20 = vsub.f32 0.0, %v98_v18 }
  0xe7   :  { %441 = vpow2.f32 %v101_v19  ;;  %v103_v21 = vmul.f32 1.442695, %v100_v20 }
  0xe9   :  { %443 = vpow2.f32 %v103_v21 }
  0xf1   :  { %v442_v22 = vpop.eup %441 }
  0xf2   :  { %v105_v23 = vadd.f32 1.0, %v442_v22  ;;  %v108_v26 = vmul.f32 -0.5, %v442_v22  ;;  %v111_v29 = vand.u32 2147483647, %v442_v22 }
  0xf3   :  { %v444_v24 = vpop.eup %443 }
  0xf4   :  { %445 = vlog2.f32 %v105_v23  ;;  %v114_v25 = vadd.f32 1.0, %v444_v24  ;;  %v117_v27 = vmul.f32 -0.5, %v444_v24  ;;  %v109_v28 = vadd.f32 1.0, %v108_v26 }
  0xf5   :  { %v120_v32 = vand.u32 2147483647, %v444_v24  ;;  %vm112_vm2 = vcmp.lt.f32.partialorder %v111_v29, 0.0004427343 }
  0xf6   :  { %447 = vlog2.f32 %v114_v25  ;;  %v118_v30 = vadd.f32 1.0, %v117_v27  ;;  %v110_v34 = vmul.f32 %v442_v22, %v109_v28 }
  0xf7   :  { %vm121_vm3 = vcmp.lt.f32.partialorder %v120_v32, 0.0004427343 }
  0xf8   :  { %v119_v39 = vmul.f32 %v444_v24, %v118_v30 }
  0xfe   :  { %v446_v31 = vpop.eup %445 }
  0xff   :  { %v107_v33 = vmul.f32 0.6931472, %v446_v31 }
 0x100   :  { %v448_v35 = vpop.eup %447 }
 0x101   :  { %v113_v37 = vsel %vm112_vm2, %v110_v34, %v107_v33  ;;  %v116_v38 = vmul.f32 0.6931472, %v448_v35 }
 0x102   :  { %v123_v40 = vadd.f32 %v113_v37, %v89_v36 }
 0x103   :  { %v122_v42 = vsel %vm121_vm3, %v119_v39, %v116_v38 }
 0x104   :  { %v125_v43 = vsel %vm93_vm4, %v374_v9, %v123_v40  ;;  %v124_v44 = vadd.f32 %v122_v42, %v90_v41 }
 0x105   :  { %v127_v46 = vmul.f32 0.1, %v125_v43 }
 0x106   :  { %v126_v45 = vsel %vm94_vm5, %v375_v13, %v124_v44 }
 0x107   :  { %v128_v47 = vmul.f32 0.1, %v126_v45 }
 0x109   :  { %v129_v48 = vpack.c.bf16 %v128_v47, %v127_v46 }
 0x10b   :  { %416 = vmatmul.mubr.msk.bf16.vlgmr.msra.gmra.mrb[0].mxu1 %vm162_vm6, %v129_v48 }
 0x1de   :  { %v200_v51 = vpop.f32.mrb[0].mxu1 }
 0x1df   :  { %v381_v52 = vadd.f32 -3.0, %v200_v51  ;;  %v417_v53 = vpop.f32.mrb[1].mxu1 }
 0x1e0   :  { %v203_v54 = vpop.f32.mrb[2].mxu1 }
 0x1e1   :  { %v211_v55 = vsub.f32 0.0, %v381_v52  ;;  %v382_v56 = vadd.f32 -3.0, %v203_v54  ;;  %v418_v57 = vpop.f32.mrb[3].mxu1  ;;  %v209_v15 = vmax.f32 %v381_v52, 0.0 }
 0x1e3   :  { %v217_v58 = vand.u32 2147483647, %v211_v55  ;;  %v212_v59 = vsub.f32 0.0, %v382_v56  ;;  %v210_v20 = vmax.f32 %v382_v56, 0.0  ;;  %vm213_vm9 = vcmp.ne.f32.partialorder %v211_v55, %v211_v55 }
 0x1e5   :  { %v219_v60 = vsub.f32 0.0, %v217_v58  ;;  %v218_v61 = vand.u32 2147483647, %v212_v59  ;;  %vm214_vm10 = vcmp.ne.f32.partialorder %v212_v59, %v212_v59 }
 0x1e7   :  { %v221_v62 = vmul.f32 1.442695, %v219_v60  ;;  %v220_v63 = vsub.f32 0.0, %v218_v61 }
 0x1e9   :  { %449 = vpow2.f32 %v221_v62  ;;  %v223_v0 = vmul.f32 1.442695, %v220_v63 }
 0x1eb   :  { %451 = vpow2.f32 %v223_v0 }
 0x1f3   :  { %v450_v1 = vpop.eup %449 }
 0x1f4   :  { %v225_v2 = vadd.f32 1.0, %v450_v1  ;;  %v228_v5 = vmul.f32 -0.5, %v450_v1  ;;  %v231_v8 = vand.u32 2147483647, %v450_v1 }
 0x1f5   :  { %v452_v3 = vpop.eup %451 }
 0x1f6   :  { %453 = vlog2.f32 %v225_v2  ;;  %v234_v4 = vadd.f32 1.0, %v452_v3  ;;  %v237_v6 = vmul.f32 -0.5, %v452_v3  ;;  %v229_v7 = vadd.f32 1.0, %v228_v5 }
 0x1f7   :  { %v240_v11 = vand.u32 2147483647, %v452_v3  ;;  %vm232_vm7 = vcmp.lt.f32.partialorder %v231_v8, 0.0004427343 }
 0x1f8   :  { %455 = vlog2.f32 %v234_v4  ;;  %v238_v9 = vadd.f32 1.0, %v237_v6  ;;  %v230_v13 = vmul.f32 %v450_v1, %v229_v7 }
 0x1f9   :  { %vm241_vm8 = vcmp.lt.f32.partialorder %v240_v11, 0.0004427343 }
 0x1fa   :  { %v239_v18 = vmul.f32 %v452_v3, %v238_v9 }
 0x200   :  { %v454_v10 = vpop.eup %453 }
 0x201   :  { %v227_v12 = vmul.f32 0.6931472, %v454_v10 }
 0x202   :  { %v456_v14 = vpop.eup %455 }
 0x203   :  { %v233_v16 = vsel %vm232_vm7, %v230_v13, %v227_v12  ;;  %v236_v17 = vmul.f32 0.6931472, %v456_v14 }
 0x204   :  { %v243_v19 = vadd.f32 %v233_v16, %v209_v15 }
 0x205   :  { %v242_v21 = vsel %vm241_vm8, %v239_v18, %v236_v17 }
 0x206   :  { %v245_v22 = vsel %vm213_vm9, %v381_v52, %v243_v19  ;;  %v244_v23 = vadd.f32 %v242_v21, %v210_v20 }
 0x207   :  { %v247_v25 = vmul.f32 0.1, %v245_v22 }
 0x208   :  { %v246_v24 = vsel %vm214_vm10, %v382_v56, %v244_v23 }
 0x209   :  { %v248_v26 = vmul.f32 0.1, %v246_v24 }
 0x20b   :  { %v249_v27 = vpack.c.bf16 %v248_v26, %v247_v25 }
 0x20d   :  { %424 = vmatmul.mubr.msk.bf16.vlgmr.msra.gmra.mrb[4].mxu0 %vm42_vm1, %v249_v27 }
 0x2e0   :  { %v303_v28 = vpop.f32.mrb[4].mxu0 }
 0x2e1   :  { %v386_v29 = vadd.f32 -3.0, %v303_v28  ;;  %v425_v30 = vpop.f32.mrb[5].mxu0 }
 0x2e2   :  { %v306_v31 = vpop.f32.mrb[6].mxu0 }
 0x2e3   :  { %v314_v32 = vsub.f32 0.0, %v386_v29  ;;  %v387_v33 = vadd.f32 -3.0, %v306_v31  ;;  %v426_v34 = vpop.f32.mrb[7].mxu0  ;;  %v312_v56 = vmax.f32 %v386_v29, 0.0 }
 0x2e5   :  { %v320_v35 = vand.u32 2147483647, %v314_v32  ;;  %v315_v36 = vsub.f32 0.0, %v387_v33  ;;  %v313_v61 = vmax.f32 %v387_v33, 0.0  ;;  %vm316_vm13 = vcmp.ne.f32.partialorder %v314_v32, %v314_v32 }
 0x2e7   :  { %v322_v37 = vsub.f32 0.0, %v320_v35  ;;  %v321_v38 = vand.u32 2147483647, %v315_v36  ;;  %vm317_vm14 = vcmp.ne.f32.partialorder %v315_v36, %v315_v36 }
 0x2e9   :  { %v324_v39 = vmul.f32 1.442695, %v322_v37  ;;  %v323_v40 = vsub.f32 0.0, %v321_v38 }
 0x2eb   :  { %457 = vpow2.f32 %v324_v39  ;;  %v326_v41 = vmul.f32 1.442695, %v323_v40 }
 0x2ed   :  { %459 = vpow2.f32 %v326_v41 }
 0x2f5   :  { %v458_v42 = vpop.eup %457 }
 0x2f6   :  { %v328_v43 = vadd.f32 1.0, %v458_v42  ;;  %v331_v46 = vmul.f32 -0.5, %v458_v42  ;;  %v334_v49 = vand.u32 2147483647, %v458_v42 }
 0x2f7   :  { %v460_v44 = vpop.eup %459 }
 0x2f8   :  { %461 = vlog2.f32 %v328_v43  ;;  %v337_v45 = vadd.f32 1.0, %v460_v44  ;;  %v340_v47 = vmul.f32 -0.5, %v460_v44  ;;  %v332_v48 = vadd.f32 1.0, %v331_v46 }
 0x2f9   :  { %v343_v52 = vand.u32 2147483647, %v460_v44  ;;  %vm335_vm11 = vcmp.lt.f32.partialorder %v334_v49, 0.0004427343 }
 0x2fa   :  { %463 = vlog2.f32 %v337_v45  ;;  %v341_v50 = vadd.f32 1.0, %v340_v47  ;;  %v333_v54 = vmul.f32 %v458_v42, %v332_v48 }
 0x2fb   :  { %vm344_vm12 = vcmp.lt.f32.partialorder %v343_v52, 0.0004427343 }
 0x2fc   :  { %v342_v59 = vmul.f32 %v460_v44, %v341_v50 }
 0x302   :  { %v462_v51 = vpop.eup %461 }
 0x303   :  { %v330_v53 = vmul.f32 0.6931472, %v462_v51 }
 0x304   :  { %v464_v55 = vpop.eup %463 }
 0x305   :  { %v336_v57 = vsel %vm335_vm11, %v333_v54, %v330_v53  ;;  %v339_v58 = vmul.f32 0.6931472, %v464_v55 }
 0x306   :  { %v346_v60 = vadd.f32 %v336_v57, %v312_v56 }
 0x307   :  { %v345_v62 = vsel %vm344_vm12, %v342_v59, %v339_v58 }
 0x308   :  { %v348_v63 = vsel %vm316_vm13, %v386_v29, %v346_v60  ;;  %v347_v0 = vadd.f32 %v345_v62, %v313_v61 }
 0x309   :  { %v350_v1 = vmul.f32 0.1, %v348_v63 }
 0x30a   :  { %v349_v2 = vsel %vm317_vm14, %v387_v33, %v347_v0 }
 0x30b   :  { %352 = vst [vmem:[#allocation2] sm:$0xff] %v350_v1  ;;  %v351_v3 = vmul.f32 0.1, %v349_v2 }
 0x30d   :  { %353 = vst [vmem:[#allocation2 + $0x8] sm:$0xff] %v351_v3 }
 0x30e   :  { %476 = shalt.err (!%p473_p4)
}
 0x30f   :  { %s477_s8 = scalar_lea.hbm %s575_s4, 256 }
 0x310   :  { %p478_p5 = scmp.ne.s32.totalorder %s575_s4, %s477_s8  ;;  %p481_p6 = scmp.lt.u32.totalorder %s477_s8, %s575_s4 }
 0x312   :  { %p483_p7 = pnand %p481_p6, %p478_p5 }
 0x314   :  { %486 = shalt.err (!%p483_p7)
}
 0x315   :  { %s492_s13 = smov 128   ;;  %s493_s14 = smov 8  }
 0x316   :  { %365 = dma.vmem_to_hbm [thread:$0]  %s360_s30, 256, %s575_s4, [#allocation3], %s492_s13, %s492_s13, %s493_s14  }
 0x317   :  { %487 = dma.done.wait [#allocation3], 256  }
 0x318   :  { %488 = vsyncadd [#allocation3], 4294967040 }
 0x319   :  { %369 = vsyncpa [#allocation3], 1 }

</bundles_post_ra>
